<compile_context>
chip_gen: v7x
topology: tpu7x:2x2x1
jax: 0.10.0
libtpu: 0.0.40
codegen_flags: <defaults>
</compile_context>

<pallas_src>
import jax
import jax.numpy as jnp
from jax import lax
from jax.experimental import pallas as pl
from jax.experimental.pallas import tpu as pltpu


def _make_gru_kernel(T, T_pad, H):
    """Build a kernel closure with static T / T_pad / H baked in."""

    def kernel(tok_ref,    # SMEM (T_pad,) int32: scalar-prefetched token ids
               emb_ref,    # VMEM (V, H): full embedding table (resident)
               h0_ref,     # VMEM (1, H): initial hidden state
               wi_ref,     # VMEM (H, 3H): fused [W_ir|W_iz|W_in], pre-transposed
               wh_ref,     # VMEM (H, 3H): fused [W_hr|W_hz|W_hn], pre-transposed
               b_ref,      # VMEM (2, 3H): row 0 = b_ih, row 1 = b_hh
               out_ref,    # VMEM (T_pad, H): outputs (== hidden per step)
               x_scr,      # VMEM scratch (T_pad, H): gathered embeddings
               gi_scr):    # VMEM scratch (T_pad, 3H): hoisted input gates
        # Static no-op when T == T_pad; otherwise keep padded rows defined.
        if T < T_pad:
            out_ref[...] = jnp.zeros_like(out_ref)

        # ---- Phase 1: in-VMEM gather of the embedding rows for all steps. ----
        def gather(t, carry):
            idx = tok_ref[t]
            x_scr[pl.ds(t, 1), :] = emb_ref[pl.ds(idx, 1), :]
            return carry

        lax.fori_loop(0, T_pad, gather, 0, unroll=(T_pad <= 32))

        # ---- Phase 2: hoisted input-gate matmul for the WHOLE sequence. ------
        # (T_pad, H) @ (H, 3H) -> one MXU push that actually fills rows.
        gi_scr[...] = (
            jnp.dot(x_scr[...], wi_ref[...], preferred_element_type=jnp.float32)
            + b_ref[0:1, :]
        )

        # ---- Phase 3: serial recurrence, h carried in vregs. -----------------
        def step(t, h):
            gi_t = gi_scr[pl.ds(t, 1), :]                       # (1, 3H)
            gh = jnp.dot(h, wh_ref[...],
                         preferred_element_type=jnp.float32) + b_ref[1:2, :]
            r = jax.nn.sigmoid(gi_t[:, :H] + gh[:, :H])
            z = jax.nn.sigmoid(gi_t[:, H:2 * H] + gh[:, H:2 * H])
            n = jnp.tanh(gi_t[:, 2 * H:] + r * gh[:, 2 * H:])
            h_new = (1.0 - z) * n + z * h
            out_ref[pl.ds(t, 1), :] = h_new
            return h_new

        lax.fori_loop(0, T, step, h0_ref[...], unroll=(T <= 32))

    return kernel


def encoder_rnn_sequence(tokens, hidden, params):
    """Run the GRU encoder over a token sequence in ONE pallas_call.

    tokens: int (T,), hidden: f32 (1, 1, H).
    Returns (outputs (T, 1, H), hidden (1, 1, H)).
    """
    emb = params["embedding"].astype(jnp.float32)                # (V, H)
    V, H = emb.shape
    T = int(tokens.shape[0])
    T_pad = max(8, ((T + 7) // 8) * 8)                           # sublane-aligned

    wi = params["w_ih"].T.astype(jnp.float32)                    # (H, 3H)
    wh = params["w_hh"].T.astype(jnp.float32)                    # (H, 3H)
    b = jnp.stack([params["b_ih"], params["b_hh"]], axis=0).astype(jnp.float32)

    tok = jnp.zeros((T_pad,), jnp.int32).at[:T].set(
        tokens.reshape(T).astype(jnp.int32))
    h0 = hidden.reshape(1, H).astype(jnp.float32)

    kernel = _make_gru_kernel(T, T_pad, H)

    grid_spec = pltpu.PrefetchScalarGridSpec(
        num_scalar_prefetch=1,                                   # token ids -> SMEM
        grid=(1,),                                               # single invocation
        in_specs=[
            pl.BlockSpec((V, H), lambda i, tok: (0, 0)),         # whole emb table
            pl.BlockSpec((1, H), lambda i, tok: (0, 0)),         # h0
            pl.BlockSpec((H, 3 * H), lambda i, tok: (0, 0)),     # Wi (resident)
            pl.BlockSpec((H, 3 * H), lambda i, tok: (0, 0)),     # Wh (resident)
            pl.BlockSpec((2, 3 * H), lambda i, tok: (0, 0)),     # biases
        ],
        out_specs=pl.BlockSpec((T_pad, H), lambda i, tok: (0, 0)),
        scratch_shapes=[
            pltpu.VMEM((T_pad, H), jnp.float32),                 # gathered X
            pltpu.VMEM((T_pad, 3 * H), jnp.float32),             # hoisted GI
        ],
    )

    outputs = pl.pallas_call(
        kernel,
        out_shape=jax.ShapeDtypeStruct((T_pad, H), jnp.float32),
        grid_spec=grid_spec,
        compiler_params=pltpu.CompilerParams(
            dimension_semantics=("arbitrary",)),                 # serial recurrence
    )(tok, emb, h0, wi, wh, b)

    outs = outputs[:T].reshape(T, 1, H)
    hidden_out = outputs[T - 1:T].reshape(1, 1, H)               # h_T == last output
    return outs, hidden_out


def encoder_rnn_forward(token, hidden, params):
    """Exact analogue of EncoderRNN.forward: one token, one step.

    token: int (1,), hidden: f32 (1,1,H). Returns (output, hidden), each (1,1,H).
    """
    outputs, h_new = encoder_rnn_sequence(token.reshape(1), hidden, params)
    return outputs.reshape(1, 1, -1), h_new


def init_params(vocab, H, key):
    """Deterministic synthetic init mirroring the module's _init_weights_ intent."""
    k_emb, k_ih, k_hh = jax.random.split(key, 3)
    gain = 5.0 / 3.0
    # Embedding: xavier_normal(gain=5/3) * 0.1
    std_emb = gain * (2.0 / (vocab + H)) ** 0.5
    embedding = jax.random.normal(k_emb, (vocab, H), jnp.float32) * std_emb * 0.1
    # weight_ih: xavier_normal
    std_ih = (2.0 / (H + H)) ** 0.5
    w_ih = jax.random.normal(k_ih, (3 * H, H), jnp.float32) * std_ih
    # weight_hh: orthogonal (built per-gate block)
    blocks = []
    for kk in jax.random.split(k_hh, 3):
        a = jax.random.normal(kk, (H, H), jnp.float32)
        q, r = jnp.linalg.qr(a)
        d = jnp.diag(r)
        q = q * jnp.where(d >= 0, 1.0, -1.0)[None, :]
        blocks.append(q)
    w_hh = jnp.concatenate(blocks, axis=0)
    # biases: constant 0.01
    b_ih = jnp.full((3 * H,), 0.01, jnp.float32)
    b_hh = jnp.full((3 * H,), 0.01, jnp.float32)
    return {"embedding": embedding, "w_ih": w_ih, "w_hh": w_hh,
            "b_ih": b_ih, "b_hh": b_hh}


def _reference_sequence(tokens, hidden, params):
    """Pure-JAX reference of the same GRU over a sequence (torch.nn.GRU semantics)."""
    emb = params["embedding"]
    H = emb.shape[1]
    h = hidden.reshape(1, H)
    outs = []
    for tkn in list(tokens):
        x = emb[tkn].reshape(1, H)
        gi = x @ params["w_ih"].T + params["b_ih"]
        gh = h @ params["w_hh"].T + params["b_hh"]
        i_r, i_z, i_n = gi[:, :H], gi[:, H:2 * H], gi[:, 2 * H:]
        h_r, h_z, h_n = gh[:, :H], gh[:, H:2 * H], gh[:, 2 * H:]
        r = jax.nn.sigmoid(i_r + h_r)
        z = jax.nn.sigmoid(i_z + h_z)
        n = jnp.tanh(i_n + r * h_n)
        h = (1.0 - z) * n + z * h
        outs.append(h)
    return jnp.stack(outs, axis=0), h.reshape(1, 1, H)


if __name__ == "__main__":
    VOCAB = 50
    HIDDEN = 128          # lane-dense activation width (multiple of 128)
    T = 8                 # small example sequence length

    key = jax.random.PRNGKey(0)
    params = init_params(VOCAB, HIDDEN, key)

    tokens = jax.random.randint(jax.random.PRNGKey(1), (T,), 0, VOCAB, dtype=jnp.int32)
    hidden0 = jnp.zeros((1, 1, HIDDEN), dtype=jnp.float32)   # initHidden()

    # --- single-step call (exact EncoderRNN.forward semantics) ---
    out1, h1 = encoder_rnn_forward(tokens[:1], hidden0, params)
    out1 = jax.block_until_ready(out1)
    h1 = jax.block_until_ready(h1)
    ref_o1, ref_h1 = _reference_sequence(tokens[:1], hidden0, params)
    assert out1.shape == (1, 1, HIDDEN) and h1.shape == (1, 1, HIDDEN)
    assert jnp.allclose(out1, ref_o1.reshape(1, 1, HIDDEN), atol=1e-3), "single-step output mismatch"
    assert jnp.allclose(h1, ref_h1, atol=1e-3), "single-step hidden mismatch"

    # --- full-sequence call (time loop + gather + hoisted GI inside one kernel) ---
    outs, hT = encoder_rnn_sequence(tokens, hidden0, params)
    outs = jax.block_until_ready(outs)
    hT = jax.block_until_ready(hT)
    ref_outs, ref_hT = _reference_sequence(tokens, hidden0, params)
    assert outs.shape == (T, 1, HIDDEN) and hT.shape == (1, 1, HIDDEN)
    assert jnp.allclose(outs, ref_outs, atol=1e-3), "sequence outputs mismatch vs reference"
    assert jnp.allclose(hT, ref_hT, atol=1e-3), "final hidden mismatch vs reference"

    print("KERNEL_OK")
</pallas_src>

<mosaic_0001>
module attributes {stable_mosaic.version = 11 : i64} {
  func.func @kernel(%arg0: i32, %arg1: memref<8xi32, #tpu.memory_space<smem>>, %arg2: memref<50x128xf32, #tpu.memory_space<vmem>>, %arg3: memref<1x128xf32, #tpu.memory_space<vmem>>, %arg4: memref<128x384xf32, #tpu.memory_space<vmem>>, %arg5: memref<128x384xf32, #tpu.memory_space<vmem>>, %arg6: memref<2x384xf32, #tpu.memory_space<vmem>>, %arg7: memref<8x128xf32, #tpu.memory_space<vmem>>, %arg8: memref<8x128xf32, #tpu.memory_space<vmem>>, %arg9: memref<8x384xf32, #tpu.memory_space<vmem>>) attributes {dimension_semantics = [#tpu.dimension_semantics<arbitrary>], iteration_bounds = array<i64: 1>, scalar_prefetch = 1 : i64, scratch_operands = 2 : i64, tpu.core_type = #tpu.core_type<tc>, window_params = [{pipeline_mode = #tpu.pipeline_mode<synchronous>, transform_indices = @transform_0, window_bounds = array<i64: 50, 128>}, {pipeline_mode = #tpu.pipeline_mode<synchronous>, transform_indices = @transform_1, window_bounds = array<i64: 1, 128>}, {pipeline_mode = #tpu.pipeline_mode<synchronous>, transform_indices = @transform_2, window_bounds = array<i64: 128, 384>}, {pipeline_mode = #tpu.pipeline_mode<synchronous>, transform_indices = @transform_3, window_bounds = array<i64: 128, 384>}, {pipeline_mode = #tpu.pipeline_mode<synchronous>, transform_indices = @transform_4, window_bounds = array<i64: 2, 384>}, {pipeline_mode = #tpu.pipeline_mode<synchronous>, transform_indices = @transform_5, window_bounds = array<i64: 8, 128>}]} {
    %cst = arith.constant 0.000000e+00 : f32
    %0 = vector.broadcast %cst : f32 to vector<8x128xf32>
    %c0 = arith.constant 0 : index
    %c0_0 = arith.constant 0 : index
    %1 = vector.load %arg7[%c0, %c0_0] : memref<8x128xf32, #tpu.memory_space<vmem>>, vector<8x128xf32>
    tpu.vector_store %arg7[%c0, %c0_0], %0 {strides = array<i32>} : memref<8x128xf32, #tpu.memory_space<vmem>>, vector<8x128xf32>,
    %c0_i32 = arith.constant 0 : i32
    %2 = arith.index_cast %c0_i32 : i32 to index
    %3 = memref.load %arg1[%2] : memref<8xi32, #tpu.memory_space<smem>>
    %4 = arith.index_cast %3 : i32 to index
    %c0_1 = arith.constant 0 : index
    %5 = vector.load %arg2[%4, %c0_1] : memref<50x128xf32, #tpu.memory_space<vmem>>, vector<1x128xf32>
    %6 = arith.index_cast %c0_i32 : i32 to index
    %c0_2 = arith.constant 0 : index
    %7 = vector.load %arg8[%6, %c0_2] : memref<8x128xf32, #tpu.memory_space<vmem>>, vector<1x128xf32>
    tpu.vector_store %arg8[%6, %c0_2], %5 {strides = array<i32>} : memref<8x128xf32, #tpu.memory_space<vmem>>, vector<1x128xf32>,
    %c1_i32 = arith.constant 1 : i32
    %8 = arith.index_cast %c1_i32 : i32 to index
    %9 = memref.load %arg1[%8] : memref<8xi32, #tpu.memory_space<smem>>
    %10 = arith.index_cast %9 : i32 to index
    %c0_3 = arith.constant 0 : index
    %11 = vector.load %arg2[%10, %c0_3] : memref<50x128xf32, #tpu.memory_space<vmem>>, vector<1x128xf32>
    %12 = arith.index_cast %c1_i32 : i32 to index
    %c0_4 = arith.constant 0 : index
    %13 = vector.load %arg8[%12, %c0_4] : memref<8x128xf32, #tpu.memory_space<vmem>>, vector<1x128xf32>
    tpu.vector_store %arg8[%12, %c0_4], %11 {strides = array<i32>} : memref<8x128xf32, #tpu.memory_space<vmem>>, vector<1x128xf32>,
    %c2_i32 = arith.constant 2 : i32
    %14 = arith.index_cast %c2_i32 : i32 to index
    %15 = memref.load %arg1[%14] : memref<8xi32, #tpu.memory_space<smem>>
    %16 = arith.index_cast %15 : i32 to index
    %c0_5 = arith.constant 0 : index
    %17 = vector.load %arg2[%16, %c0_5] : memref<50x128xf32, #tpu.memory_space<vmem>>, vector<1x128xf32>
    %18 = arith.index_cast %c2_i32 : i32 to index
    %c0_6 = arith.constant 0 : index
    %19 = vector.load %arg8[%18, %c0_6] : memref<8x128xf32, #tpu.memory_space<vmem>>, vector<1x128xf32>
    tpu.vector_store %arg8[%18, %c0_6], %17 {strides = array<i32>} : memref<8x128xf32, #tpu.memory_space<vmem>>, vector<1x128xf32>,
    %c3_i32 = arith.constant 3 : i32
    %20 = arith.index_cast %c3_i32 : i32 to index
    %21 = memref.load %arg1[%20] : memref<8xi32, #tpu.memory_space<smem>>
    %22 = arith.index_cast %21 : i32 to index
    %c0_7 = arith.constant 0 : index
    %23 = vector.load %arg2[%22, %c0_7] : memref<50x128xf32, #tpu.memory_space<vmem>>, vector<1x128xf32>
    %24 = arith.index_cast %c3_i32 : i32 to index
    %c0_8 = arith.constant 0 : index
    %25 = vector.load %arg8[%24, %c0_8] : memref<8x128xf32, #tpu.memory_space<vmem>>, vector<1x128xf32>
    tpu.vector_store %arg8[%24, %c0_8], %23 {strides = array<i32>} : memref<8x128xf32, #tpu.memory_space<vmem>>, vector<1x128xf32>,
    %c4_i32 = arith.constant 4 : i32
    %26 = arith.index_cast %c4_i32 : i32 to index
    %27 = memref.load %arg1[%26] : memref<8xi32, #tpu.memory_space<smem>>
    %28 = arith.index_cast %27 : i32 to index
    %c0_9 = arith.constant 0 : index
    %29 = vector.load %arg2[%28, %c0_9] : memref<50x128xf32, #tpu.memory_space<vmem>>, vector<1x128xf32>
    %30 = arith.index_cast %c4_i32 : i32 to index
    %c0_10 = arith.constant 0 : index
    %31 = vector.load %arg8[%30, %c0_10] : memref<8x128xf32, #tpu.memory_space<vmem>>, vector<1x128xf32>
    tpu.vector_store %arg8[%30, %c0_10], %29 {strides = array<i32>} : memref<8x128xf32, #tpu.memory_space<vmem>>, vector<1x128xf32>,
    %c5_i32 = arith.constant 5 : i32
    %32 = arith.index_cast %c5_i32 : i32 to index
    %33 = memref.load %arg1[%32] : memref<8xi32, #tpu.memory_space<smem>>
    %34 = arith.index_cast %33 : i32 to index
    %c0_11 = arith.constant 0 : index
    %35 = vector.load %arg2[%34, %c0_11] : memref<50x128xf32, #tpu.memory_space<vmem>>, vector<1x128xf32>
    %36 = arith.index_cast %c5_i32 : i32 to index
    %c0_12 = arith.constant 0 : index
    %37 = vector.load %arg8[%36, %c0_12] : memref<8x128xf32, #tpu.memory_space<vmem>>, vector<1x128xf32>
    tpu.vector_store %arg8[%36, %c0_12], %35 {strides = array<i32>} : memref<8x128xf32, #tpu.memory_space<vmem>>, vector<1x128xf32>,
    %c6_i32 = arith.constant 6 : i32
    %38 = arith.index_cast %c6_i32 : i32 to index
    %39 = memref.load %arg1[%38] : memref<8xi32, #tpu.memory_space<smem>>
    %40 = arith.index_cast %39 : i32 to index
    %c0_13 = arith.constant 0 : index
    %41 = vector.load %arg2[%40, %c0_13] : memref<50x128xf32, #tpu.memory_space<vmem>>, vector<1x128xf32>
    %42 = arith.index_cast %c6_i32 : i32 to index
    %c0_14 = arith.constant 0 : index
    %43 = vector.load %arg8[%42, %c0_14] : memref<8x128xf32, #tpu.memory_space<vmem>>, vector<1x128xf32>
    tpu.vector_store %arg8[%42, %c0_14], %41 {strides = array<i32>} : memref<8x128xf32, #tpu.memory_space<vmem>>, vector<1x128xf32>,
    %c7_i32 = arith.constant 7 : i32
    %44 = arith.index_cast %c7_i32 : i32 to index
    %45 = memref.load %arg1[%44] : memref<8xi32, #tpu.memory_space<smem>>
    %46 = arith.index_cast %45 : i32 to index
    %c0_15 = arith.constant 0 : index
    %47 = vector.load %arg2[%46, %c0_15] : memref<50x128xf32, #tpu.memory_space<vmem>>, vector<1x128xf32>
    %48 = arith.index_cast %c7_i32 : i32 to index
    %c0_16 = arith.constant 0 : index
    %49 = vector.load %arg8[%48, %c0_16] : memref<8x128xf32, #tpu.memory_space<vmem>>, vector<1x128xf32>
    tpu.vector_store %arg8[%48, %c0_16], %47 {strides = array<i32>} : memref<8x128xf32, #tpu.memory_space<vmem>>, vector<1x128xf32>,
    %c8_i32 = arith.constant 8 : i32
    %c0_17 = arith.constant 0 : index
    %c0_18 = arith.constant 0 : index
    %50 = vector.load %arg8[%c0_17, %c0_18] : memref<8x128xf32, #tpu.memory_space<vmem>>, vector<8x128xf32>
    %c0_19 = arith.constant 0 : index
    %c0_20 = arith.constant 0 : index
    %51 = vector.load %arg4[%c0_19, %c0_20] : memref<128x384xf32, #tpu.memory_space<vmem>>, vector<128x384xf32>
    %cst_21 = arith.constant dense<0.000000e+00> : vector<8x384xf32>
    %52 = tpu.matmul %50, %51, %cst_21 {dimension_numbers = #tpu.dot_dimension_numbers<[1], [0], [0], [1], [0, 0, 1, 1], [], []>} : vector<8x128xf32>, vector<128x384xf32>, vector<8x384xf32> -> vector<8x384xf32>
    %c0_22 = arith.constant 0 : index
    %c0_23 = arith.constant 0 : index
    %53 = vector.load %arg6[%c0_22, %c0_23] : memref<2x384xf32, #tpu.memory_space<vmem>>, vector<1x384xf32>
    %54 = vector.broadcast %53 : vector<1x384xf32> to vector<8x384xf32>
    %55 = arith.addf %52, %54 : vector<8x384xf32>
    %c0_24 = arith.constant 0 : index
    %c0_25 = arith.constant 0 : index
    %56 = vector.load %arg9[%c0_24, %c0_25] : memref<8x384xf32, #tpu.memory_space<vmem>>, vector<8x384xf32>
    tpu.vector_store %arg9[%c0_24, %c0_25], %55 {strides = array<i32>} : memref<8x384xf32, #tpu.memory_space<vmem>>, vector<8x384xf32>,
    %c0_26 = arith.constant 0 : index
    %c0_27 = arith.constant 0 : index
    %57 = vector.load %arg3[%c0_26, %c0_27] : memref<1x128xf32, #tpu.memory_space<vmem>>, vector<1x128xf32>
    %c0_i32_28 = arith.constant 0 : i32
    %58 = arith.index_cast %c0_i32_28 : i32 to index
    %c0_29 = arith.constant 0 : index
    %59 = vector.load %arg9[%58, %c0_29] : memref<8x384xf32, #tpu.memory_space<vmem>>, vector<1x384xf32>
    %c0_30 = arith.constant 0 : index
    %c0_31 = arith.constant 0 : index
    %60 = vector.load %arg5[%c0_30, %c0_31] : memref<128x384xf32, #tpu.memory_space<vmem>>, vector<128x384xf32>
    %cst_32 = arith.constant dense<0.000000e+00> : vector<1x384xf32>
    %61 = tpu.matmul %57, %60, %cst_32 {dimension_numbers = #tpu.dot_dimension_numbers<[1], [0], [0], [1], [0, 0, 1, 1], [], []>} : vector<1x128xf32>, vector<128x384xf32>, vector<1x384xf32> -> vector<1x384xf32>
    %c1 = arith.constant 1 : index
    %c0_33 = arith.constant 0 : index
    %62 = vector.load %arg6[%c1, %c0_33] : memref<2x384xf32, #tpu.memory_space<vmem>>, vector<1x384xf32>
    %63 = arith.addf %61, %62 : vector<1x384xf32>
    %64 = vector.extract_strided_slice %59 {offsets = [0, 0], sizes = [1, 128], strides = [1, 1]} : vector<1x384xf32> to vector<1x128xf32>
    %65 = vector.extract_strided_slice %63 {offsets = [0, 0], sizes = [1, 128], strides = [1, 1]} : vector<1x384xf32> to vector<1x128xf32>
    %66 = arith.addf %64, %65 : vector<1x128xf32>
    %67 = arith.negf %66 : vector<1x128xf32>
    %68 = math.exp %67 : vector<1x128xf32>
    %cst_34 = arith.constant 1.000000e+00 : f32
    %69 = vector.broadcast %cst_34 : f32 to vector<1x128xf32>
    %70 = arith.addf %69, %68 : vector<1x128xf32>
    %71 = arith.divf %69, %70 : vector<1x128xf32>
    %72 = vector.extract_strided_slice %59 {offsets = [0, 128], sizes = [1, 128], strides = [1, 1]} : vector<1x384xf32> to vector<1x128xf32>
    %73 = vector.extract_strided_slice %63 {offsets = [0, 128], sizes = [1, 128], strides = [1, 1]} : vector<1x384xf32> to vector<1x128xf32>
    %74 = arith.addf %72, %73 : vector<1x128xf32>
    %75 = arith.negf %74 : vector<1x128xf32>
    %76 = math.exp %75 : vector<1x128xf32>
    %cst_35 = arith.constant 1.000000e+00 : f32
    %77 = vector.broadcast %cst_35 : f32 to vector<1x128xf32>
    %78 = arith.addf %77, %76 : vector<1x128xf32>
    %79 = arith.divf %77, %78 : vector<1x128xf32>
    %80 = vector.extract_strided_slice %59 {offsets = [0, 256], sizes = [1, 128], strides = [1, 1]} : vector<1x384xf32> to vector<1x128xf32>
    %81 = vector.extract_strided_slice %63 {offsets = [0, 256], sizes = [1, 128], strides = [1, 1]} : vector<1x384xf32> to vector<1x128xf32>
    %82 = arith.mulf %71, %81 : vector<1x128xf32>
    %83 = arith.addf %80, %82 : vector<1x128xf32>
    %84 = math.tanh %83 : vector<1x128xf32>
    %cst_36 = arith.constant 1.000000e+00 : f32
    %85 = vector.broadcast %cst_36 : f32 to vector<1x128xf32>
    %86 = arith.subf %85, %79 : vector<1x128xf32>
    %87 = arith.mulf %86, %84 : vector<1x128xf32>
    %88 = arith.mulf %79, %57 : vector<1x128xf32>
    %89 = arith.addf %87, %88 : vector<1x128xf32>
    %90 = arith.index_cast %c0_i32_28 : i32 to index
    %c0_37 = arith.constant 0 : index
    %91 = vector.load %arg7[%90, %c0_37] : memref<8x128xf32, #tpu.memory_space<vmem>>, vector<1x128xf32>
    tpu.vector_store %arg7[%90, %c0_37], %89 {strides = array<i32>} : memref<8x128xf32, #tpu.memory_space<vmem>>, vector<1x128xf32>,
    %c1_i32_38 = arith.constant 1 : i32
    return
  }
  func.func @transform_0(%arg0: i32, %arg1: memref<8xi32, #tpu.memory_space<smem>>) -> (i32, i32) {
    %c0_i32 = arith.constant 0 : i32
    %c0_i32_0 = arith.constant 0 : i32
    %c0_i32_1 = arith.constant 0 : i32
    return %c0_i32, %c0_i32_0 : i32, i32
  }
  func.func @transform_1(%arg0: i32, %arg1: memref<8xi32, #tpu.memory_space<smem>>) -> (i32, i32) {
    %c0_i32 = arith.constant 0 : i32
    %c0_i32_0 = arith.constant 0 : i32
    %c0_i32_1 = arith.constant 0 : i32
    return %c0_i32, %c0_i32_0 : i32, i32
  }
  func.func @transform_2(%arg0: i32, %arg1: memref<8xi32, #tpu.memory_space<smem>>) -> (i32, i32) {
    %c0_i32 = arith.constant 0 : i32
    %c0_i32_0 = arith.constant 0 : i32
    %c0_i32_1 = arith.constant 0 : i32
    return %c0_i32, %c0_i32_0 : i32, i32
  }
  func.func @transform_3(%arg0: i32, %arg1: memref<8xi32, #tpu.memory_space<smem>>) -> (i32, i32) {
    %c0_i32 = arith.constant 0 : i32
    %c0_i32_0 = arith.constant 0 : i32
    %c0_i32_1 = arith.constant 0 : i32
    return %c0_i32, %c0_i32_0 : i32, i32
  }
  func.func @transform_4(%arg0: i32, %arg1: memref<8xi32, #tpu.memory_space<smem>>) -> (i32, i32) {
    %c0_i32 = arith.constant 0 : i32
    %c0_i32_0 = arith.constant 0 : i32
    %c0_i32_1 = arith.constant 0 : i32
    return %c0_i32, %c0_i32_0 : i32, i32
  }
  func.func @transform_5(%arg0: i32, %arg1: memref<8xi32, #tpu.memory_space<smem>>) -> (i32, i32) {
    %c0_i32 = arith.constant 0 : i32
    %c0_i32_0 = arith.constant 0 : i32
    %c0_i32_1 = arith.constant 0 : i32
    return %c0_i32, %c0_i32_0 : i32, i32
  }
}

</mosaic_0001>

<bundles_post_ra>
// kernel: tpu_custom_call.1
= control target key start
LH: loop header
LB: loop body
LE: loop exit
PB: predicated region body
PF: predicated region fallthrough
CT: control target
= control target key end

     0   :  { %s1093_s0 = inlined_call_operand.hbm [shape: s32[8], index: 0, kind: input, shape index: {}]   ;;  %s1094_s1 = inlined_call_operand.hbm [shape: f32[50,128], index: 1, kind: input, shape index: {}]   ;;  %s1095_s2 = inlined_call_operand.vmem [shape: f32[1,128], index: 2, kind: input, shape index: {}]   ;;  %s1096_s3 = inlined_call_operand.hbm [shape: f32[128,384], index: 3, kind: input, shape index: {}]   ;;  %s1097_s4 = inlined_call_operand.hbm [shape: f32[128,384], index: 4, kind: input, shape index: {}]   ;;  %s1098_s5 = inlined_call_operand.vmem [shape: f32[2,384], index: 5, kind: input, shape index: {}]   ;;  %s1099_s6 = inlined_call_operand.hbm [shape: f32[8,128], index: 6, kind: output, shape index: {}]  }
   0x1   :  { %s818_s23 = scalar_lea.hbm %s1093_s0, 16 }
   0x2   :  { %p819_p0 = scmp.ne.s32.totalorder %s1093_s0, %s818_s23  ;;  %p822_p1 = scmp.lt.u32.totalorder %s818_s23, %s1093_s0 }
   0x4   :  { %p824_p2 = pnand %p822_p1, %p819_p0 }
   0x6   :  { %827 = shalt.err (!%p824_p2)  }
   0x7   :  { %s924_s28 = smov [#allocation5]  }
   0x8   :  { %12 = dma.hbm_to_smem %s1093_s0, 16, %s924_s28, [#allocation4] }
   0x9   :  { %916 = dma.done.wait [#allocation4], 16 }
   0xa   :  { %917 = vsyncadd [#allocation4], 4294967280 }
   0xb   :  { %14 = sfence }
   0xc   :  { %15 = vsyncpa [#allocation7], 0 }
   0xd   :  { %16 = vsyncpa [#allocation10], 0 }
   0xe   :  { %17 = vsyncpa [#allocation8], 0  ;;  %s925_s7 = smov [#allocation9]   ;;  %s828_s11 = scalar_lea.hbm %s1096_s3, 6144 }
   0xf   :  { %s37_s8 = sshll.u32 %s925_s7, 4  ;;  %p829_p3 = scmp.ne.s32.totalorder %s1096_s3, %s828_s11  ;;  %s38_s8 = int_to_ptr.vmem [resolvable:$true] %s37_s8 }
  0x10   :  { %p832_p4 = scmp.lt.u32.totalorder %s828_s11, %s1096_s3 }
  0x12   :  { %p834_p5 = pnand %p832_p4, %p829_p3 }
  0x14   :  { %837 = shalt.err (!%p834_p5)
}
  0x15   :  { %s838_s0 = scalar_lea.vmem %s38_s8, 6144  ;;  %p843_p7 = scmp.lt.s32.totalorder %s38_s8, %s38_s8 }
  0x16   :  { %p839_p6 = scmp.ne.s32.totalorder %s38_s8, %s838_s0  ;;  %p844_p8 = scmp.lt.s32.totalorder %s838_s0, %s838_s0 }
  0x18   :  { %p845_p9 = por %p844_p8, %p843_p7 }
  0x1a   :  { %p846_p10 = pnand %p845_p9, %p839_p6 }
  0x1c   :  { %849 = shalt.err (!%p846_p10)
}
  0x1d   :  { %s926_s16 = smov 384   ;;  %s927_s17 = smov 24  }
  0x1e   :  { %43 = dma.hbm_to_vmem [thread:$0]  %s1096_s3, 6144, %s38_s8, [#allocation10], %s926_s16, %s926_s16, %s927_s17  }
  0x1f   :  { %s928_s20 = smov [#allocation6]   ;;  %s850_s24 = scalar_lea.hbm %s1094_s1, 896 }
  0x20   :  { %s23_s21 = sshll.u32 %s928_s20, 4  ;;  %p851_p11 = scmp.ne.s32.totalorder %s1094_s1, %s850_s24  ;;  %s24_s21 = int_to_ptr.vmem [resolvable:$true] %s23_s21 }
  0x21   :  { %p854_p12 = scmp.lt.u32.totalorder %s850_s24, %s1094_s1 }
  0x23   :  { %p856_p13 = pnand %p854_p12, %p851_p11 }
  0x25   :  { %859 = shalt.err (!%p856_p13)
}
  0x26   :  { %s860_s29 = scalar_lea.vmem %s24_s21, 896  ;;  %p865_p1 = scmp.lt.s32.totalorder %s24_s21, %s24_s21 }
  0x27   :  { %p861_p0 = scmp.ne.s32.totalorder %s24_s21, %s860_s29  ;;  %p866_p2 = scmp.lt.s32.totalorder %s860_s29, %s860_s29 }
  0x29   :  { %p867_p3 = por %p866_p2, %p865_p1 }
  0x2b   :  { %p868_p4 = pnand %p867_p3, %p861_p0 }
  0x2d   :  { %871 = shalt.err (!%p868_p4)
}
  0x2e   :  { %s929_s3 = smov 128   ;;  %s930_s30 = smov 8  }
  0x2f   :  { %29 = dma.hbm_to_vmem [thread:$0]  %s1094_s1, 896, %s24_s21, [#allocation7], %s929_s3, %s929_s3, %s930_s30  }
  0x30   :  { %s931_s9 = smov [#allocation11]   ;;  %s872_s13 = scalar_lea.hbm %s1097_s4, 6144 }
  0x31   :  { %s49_s10 = sshll.u32 %s931_s9, 4  ;;  %p873_p5 = scmp.ne.s32.totalorder %s1097_s4, %s872_s13  ;;  %s50_s10 = int_to_ptr.vmem [resolvable:$true] %s49_s10 }
  0x32   :  { %p876_p6 = scmp.lt.u32.totalorder %s872_s13, %s1097_s4 }
  0x34   :  { %p878_p7 = pnand %p876_p6, %p873_p5 }
  0x36   :  { %881 = shalt.err (!%p878_p7)
}
  0x37   :  { %s882_s19 = scalar_lea.vmem %s50_s10, 6144  ;;  %p887_p9 = scmp.lt.s32.totalorder %s50_s10, %s50_s10 }
  0x38   :  { %p883_p8 = scmp.ne.s32.totalorder %s50_s10, %s882_s19  ;;  %p888_p10 = scmp.lt.s32.totalorder %s882_s19, %s882_s19 }
  0x3a   :  { %p889_p11 = por %p888_p10, %p887_p9 }
  0x3c   :  { %p890_p12 = pnand %p889_p11, %p883_p8 }
  0x3e   :  { %893 = shalt.err (!%p890_p12)
}
  0x3f   :  { %55 = dma.hbm_to_vmem [thread:$0]  %s1097_s4, 6144, %s50_s10, [#allocation10], %s926_s16, %s926_s16, %s927_s17  }
  0x40   :  { %918 = dma.done.wait [#allocation7], 896  }
  0x41   :  { %919 = vsyncadd [#allocation7], 4294966400 }
  0x42   :  { %920 = dma.done.wait [#allocation10], 12288  }
  0x43   :  { %921 = vsyncadd [#allocation10], 4294955008  ;;  %v932_v0 = vmov 0.0|0.0   ;;  %v933_v1 = vmov 0.0   ;;  %vm934_vm0 = vmmov 0   ;;  %v102_v2 = vld [vmem:[#allocation9 + $0x8] sm:$0xff] }
  0x44   :  { %716 = vmatprep.subr.bf16.mxu1 %v932_v0  ;;  %230 = vmatprep.mubr.f32.mxu0 %v933_v1  ;;  %67 = vst [vmem:[#allocation12] sm:$0xff] %v933_v1  ;;  %v105_v3 = vld [vmem:[#allocation9 + $0x20] sm:$0xff]  ;;  %v104_v6 = vld [vmem:[#allocation9 + $0x18] sm:$0xff]  ;;  %v103_v7 = vld [vmem:[#allocation9 + $0x10] sm:$0xff]  ;;  %s1030_s4 = sld [smem:[#allocation5]]  ;;  %s1032_s16 = sld [smem:[#allocation5 + $0x1]] }
  0x45   :  { %646 = vmatprep.mubr.msk.f32.mxu1 %vm934_vm0, %v933_v1  ;;  %v101_v4 = vld [vmem:[#allocation9] sm:$0xff]  ;;  %v684_v5 = vpack.c.bf16 %v105_v3, %v102_v2  ;;  %v106_v8 = vld [vmem:[#allocation9 + $0x28] sm:$0xff]  ;;  %v108_v11 = vld [vmem:[#allocation9 + $0x38] sm:$0xff]  ;;  %s1034_s17 = sld [smem:[#allocation5 + $0x2]]  ;;  %s1037_s21 = sld [smem:[#allocation5 + $0x3]] }
  0x46   :  { %v686_v9 = vpack.c.bf16 %v104_v6, %v101_v4  ;;  %v717_v10 = vpack.c.bf16 %v106_v8, %v103_v7  ;;  %v111_v12 = vld [vmem:[#allocation9 + $0x50] sm:$0xff]  ;;  %v110_v15 = vld [vmem:[#allocation9 + $0x48] sm:$0xff]  ;;  %v109_v16 = vld [vmem:[#allocation9 + $0x40] sm:$0xff]  ;;  %s1039_s22 = sld [smem:[#allocation5 + $0x4]]  ;;  %s1041_s23 = sld [smem:[#allocation5 + $0x5]] }
  0x47   :  { %v107_v13 = vld [vmem:[#allocation9 + $0x30] sm:$0xff]  ;;  %685 = vmatprep.subr.bf16.mxu0 %v684_v5  ;;  %v688_v14 = vpack.c.bf16 %v111_v12, %v108_v11  ;;  %v112_v17 = vld [vmem:[#allocation9 + $0x58] sm:$0xff]  ;;  %v114_v20 = vld [vmem:[#allocation9 + $0x68] sm:$0xff]  ;;  %s1043_s24 = sld [smem:[#allocation5 + $0x6]]  ;;  %s1045_s25 = sld [smem:[#allocation5 + $0x7]] }
  0x48   :  { %687 = vmatpush1.bf16.msra.mxu0 %v686_v9  ;;  %718 = vmatpush3.bf16.msra.mxu1 %v717_v10  ;;  %v690_v18 = vpack.c.bf16 %v110_v15, %v107_v13  ;;  %v720_v19 = vpack.c.bf16 %v112_v17, %v109_v16  ;;  %v117_v21 = vld [vmem:[#allocation9 + $0x80] sm:$0xff]  ;;  %v116_v24 = vld [vmem:[#allocation9 + $0x78] sm:$0xff]  ;;  %v115_v25 = vld [vmem:[#allocation9 + $0x70] sm:$0xff] }
  0x49   :  { %v113_v22 = vld [vmem:[#allocation9 + $0x60] sm:$0xff]  ;;  %689 = vmatprep.subr.bf16.mxu0 %v688_v14  ;;  %719 = vmatprep.subr.bf16.mxu1 %v932_v0  ;;  %v692_v23 = vpack.c.bf16 %v117_v21, %v114_v20  ;;  %v118_v26 = vld [vmem:[#allocation9 + $0x88] sm:$0xff]  ;;  %v120_v27 = vld [vmem:[#allocation9 + $0x98] sm:$0xff] }
  0x4a   :  { %v123_v28 = vld [vmem:[#allocation9 + $0xb0] sm:$0xff]  ;;  %v694_v29 = vpack.c.bf16 %v116_v24, %v113_v22  ;;  %v723_v30 = vpack.c.bf16 %v118_v26, %v115_v25  ;;  %v122_v33 = vld [vmem:[#allocation9 + $0xa8] sm:$0xff]  ;;  %v121_v34 = vld [vmem:[#allocation9 + $0xa0] sm:$0xff]  ;;  %s69_s26 = scalar_lea.vmem [#allocation6], %s1030_s4  ;;  %s73_s27 = scalar_lea.vmem [#allocation6], %s1032_s16 }
  0x4b   :  { %v119_v31 = vld [vmem:[#allocation9 + $0x90] sm:$0xff]  ;;  %v696_v32 = vpack.c.bf16 %v123_v28, %v120_v27  ;;  %v124_v35 = vld [vmem:[#allocation9 + $0xb8] sm:$0xff]  ;;  %v126_v36 = vld [vmem:[#allocation9 + $0xc8] sm:$0xff]  ;;  %s77_s28 = scalar_lea.vmem [#allocation6], %s1034_s17  ;;  %s81_s29 = scalar_lea.vmem [#allocation6], %s1037_s21 }
  0x4c   :  { %691 = vmatpush1.bf16.msra.mxu0 %v690_v18  ;;  %721 = vmatpush3.bf16.msra.mxu1 %v720_v19  ;;  %v129_v37 = vld [vmem:[#allocation9 + $0xe0] sm:$0xff]  ;;  %v698_v38 = vpack.c.bf16 %v122_v33, %v119_v31  ;;  %v726_v39 = vpack.c.bf16 %v124_v35, %v121_v34  ;;  %v128_v42 = vld [vmem:[#allocation9 + $0xd8] sm:$0xff]  ;;  %v127_v43 = vld [vmem:[#allocation9 + $0xd0] sm:$0xff]  ;;  %s85_s3 = scalar_lea.vmem [#allocation6], %s1039_s22  ;;  %s89_s30 = scalar_lea.vmem [#allocation6], %s1041_s23 }
  0x4d   :  { %693 = vmatprep.subr.bf16.mxu0 %v692_v23  ;;  %722 = vmatprep.subr.bf16.mxu1 %v932_v0  ;;  %v125_v40 = vld [vmem:[#allocation9 + $0xc0] sm:$0xff]  ;;  %v700_v41 = vpack.c.bf16 %v129_v37, %v126_v36  ;;  %v130_v44 = vld [vmem:[#allocation9 + $0xe8] sm:$0xff]  ;;  %v132_v45 = vld [vmem:[#allocation9 + $0xf8] sm:$0xff]  ;;  %s93_s7 = scalar_lea.vmem [#allocation6], %s1043_s24  ;;  %s97_s8 = scalar_lea.vmem [#allocation6], %s1045_s25 }
  0x4e   :  { %v135_v46 = vld [vmem:[#allocation9 + $0x110] sm:$0xff]  ;;  %v134_v48 = vld [vmem:[#allocation9 + $0x108] sm:$0xff]  ;;  %v133_v49 = vld [vmem:[#allocation9 + $0x100] sm:$0xff]  ;;  %v702_v51 = vpack.c.bf16 %v128_v42, %v125_v40  ;;  %v729_v52 = vpack.c.bf16 %v130_v44, %v127_v43 }
  0x4f   :  { %v131_v47 = vld [vmem:[#allocation9 + $0xf0] sm:$0xff]  ;;  %v136_v50 = vld [vmem:[#allocation9 + $0x118] sm:$0xff]  ;;  %v138_v53 = vld [vmem:[#allocation9 + $0x128] sm:$0xff]  ;;  %v704_v57 = vpack.c.bf16 %v135_v46, %v132_v45 }
  0x50   :  { %695 = vmatpush1.bf16.msra.mxu0 %v694_v29  ;;  %724 = vmatpush3.bf16.msra.mxu1 %v723_v30  ;;  %v70_v54 = vld [vmem:[%s69_s26] sm:$0x1]  ;;  %v706_v2 = vpack.c.bf16 %v134_v48, %v131_v47  ;;  %v732_v3 = vpack.c.bf16 %v136_v50, %v133_v49  ;;  %v140_v6 = vld [vmem:[#allocation9 + $0x138] sm:$0xff]  ;;  %v139_v7 = vld [vmem:[#allocation9 + $0x130] sm:$0xff] }
  0x51   :  { %697 = vmatprep.subr.bf16.mxu0 %v696_v32  ;;  %725 = vmatprep.subr.bf16.mxu1 %v932_v0  ;;  %v74_v55 = vld [vmem:[%s73_s27] sm:$0x1]  ;;  %71 = vst [vmem:[#allocation2] sm:$0x1] %v70_v54  ;;  %v142_v8 = vld [vmem:[#allocation9 + $0x148] sm:$0xff]  ;;  %v144_v9 = vld [vmem:[#allocation9 + $0x158] sm:$0xff] }
  0x52   :  { %v78_v56 = vld [vmem:[%s77_s28] sm:$0x1]  ;;  %75 = vst [vmem:[#allocation2 + $0x1] sm:$0x1] %v74_v55  ;;  %v147_v10 = vld [vmem:[#allocation9 + $0x170] sm:$0xff]  ;;  %v735_v12 = vpack.c.bf16 %v142_v8, %v139_v7  ;;  %v146_v15 = vld [vmem:[#allocation9 + $0x168] sm:$0xff] }
  0x53   :  { %79 = vst [vmem:[#allocation2 + $0x2] sm:$0x1] %v78_v56  ;;  %v82_v58 = vld [vmem:[%s81_s29] sm:$0x1]  ;;  %v143_v13 = vld [vmem:[#allocation9 + $0x150] sm:$0xff]  ;;  %v712_v14 = vpack.c.bf16 %v147_v10, %v144_v9  ;;  %v148_v17 = vld [vmem:[#allocation9 + $0x178] sm:$0xff] }
  0x54   :  { %699 = vmatpush1.bf16.msra.mxu0 %v698_v38  ;;  %727 = vmatpush3.bf16.msra.mxu1 %v726_v39  ;;  %v86_v59 = vld [vmem:[%s85_s3] sm:$0x1]  ;;  %83 = vst [vmem:[#allocation2 + $0x3] sm:$0x1] %v82_v58  ;;  %v313_v18 = vld [vmem:[#allocation11 + $0x8] sm:$0xff]  ;;  %v714_v20 = vpack.c.bf16 %v146_v15, %v143_v13  ;;  %v315_v24 = vld [vmem:[#allocation11 + $0x18] sm:$0xff] }
  0x55   :  { %701 = vmatprep.subr.bf16.mxu0 %v700_v41  ;;  %728 = vmatprep.subr.bf16.mxu1 %v932_v0  ;;  %v90_v60 = vld [vmem:[%s89_s30] sm:$0x1]  ;;  %87 = vst [vmem:[#allocation2 + $0x4] sm:$0x1] %v86_v59  ;;  %v314_v25 = vld [vmem:[#allocation11 + $0x10] sm:$0xff]  ;;  %v317_v26 = vld [vmem:[#allocation11 + $0x28] sm:$0xff] }
  0x56   :  { %v141_v61 = vld [vmem:[#allocation9 + $0x140] sm:$0xff]  ;;  %91 = vst [vmem:[#allocation2 + $0x5] sm:$0x1] %v90_v60  ;;  %v319_v27 = vld [vmem:[#allocation11 + $0x38] sm:$0xff]  ;;  %v322_v28 = vld [vmem:[#allocation11 + $0x50] sm:$0xff]  ;;  %v773_v32 = vpack.c.bf16 %v317_v26, %v314_v25 }
  0x57   :  { %v94_v62 = vld [vmem:[%s93_s7] sm:$0x1]  ;;  %v708_v5 = vpack.c.bf16 %v141_v61, %v138_v53  ;;  %v318_v31 = vld [vmem:[#allocation11 + $0x30] sm:$0xff]  ;;  %v744_v33 = vpack.c.bf16 %v322_v28, %v319_v27  ;;  %v321_v34 = vld [vmem:[#allocation11 + $0x48] sm:$0xff] }
  0x58   :  { %v98_v63 = vld [vmem:[%s97_s8] sm:$0x1]  ;;  %95 = vst [vmem:[#allocation2 + $0x6] sm:$0x1] %v94_v62  ;;  %703 = vmatpush1.bf16.msra.mxu0 %v702_v51  ;;  %730 = vmatpush3.bf16.msra.mxu1 %v729_v52  ;;  %v323_v36 = vld [vmem:[#allocation11 + $0x58] sm:$0xff]  ;;  %v325_v37 = vld [vmem:[#allocation11 + $0x68] sm:$0xff]  ;;  %v746_v39 = vpack.c.bf16 %v321_v34, %v318_v31  ;;  %v151_v31 = vlaneseq }
  0x59   :  { %99 = vst [vmem:[#allocation2 + $0x7] sm:$0x1] %v98_v63  ;;  %v137_v4 = vld [vmem:[#allocation9 + $0x120] sm:$0xff]  ;;  %705 = vmatprep.subr.bf16.mxu0 %v704_v57  ;;  %731 = vmatprep.subr.bf16.mxu1 %v932_v0  ;;  %v327_v43 = vld [vmem:[#allocation11 + $0x78] sm:$0xff]  ;;  %v326_v44 = vld [vmem:[#allocation11 + $0x70] sm:$0xff] }
  0x5a   :  { %v710_v11 = vpack.c.bf16 %v140_v6, %v137_v4  ;;  %v145_v16 = vld [vmem:[#allocation9 + $0x160] sm:$0xff]  ;;  %v329_v45 = vld [vmem:[#allocation11 + $0x88] sm:$0xff]  ;;  %v331_v46 = vld [vmem:[#allocation11 + $0x98] sm:$0xff] }
  0x5b   :  { %v316_v19 = vld [vmem:[#allocation11 + $0x20] sm:$0xff]  ;;  %v738_v21 = vpack.c.bf16 %v148_v17, %v145_v16  ;;  %v334_v47 = vld [vmem:[#allocation11 + $0xb0] sm:$0xff]  ;;  %v779_v50 = vpack.c.bf16 %v329_v45, %v326_v44  ;;  %v333_v52 = vld [vmem:[#allocation11 + $0xa8] sm:$0xff] }
  0x5c   :  { %707 = vmatpush1.bf16.msra.mxu0 %v706_v2  ;;  %733 = vmatpush3.bf16.msra.mxu1 %v732_v3  ;;  %v312_v22 = vld [vmem:[#allocation11] sm:$0xff]  ;;  %v740_v23 = vpack.c.bf16 %v316_v19, %v313_v18  ;;  %v330_v49 = vld [vmem:[#allocation11 + $0x90] sm:$0xff]  ;;  %v752_v51 = vpack.c.bf16 %v334_v47, %v331_v46  ;;  %v335_v54 = vld [vmem:[#allocation11 + $0xb8] sm:$0xff] }
  0x5d   :  { %709 = vmatprep.subr.bf16.mxu0 %v708_v5  ;;  %734 = vmatprep.subr.bf16.mxu1 %v932_v0  ;;  %v742_v30 = vpack.c.bf16 %v315_v24, %v312_v22  ;;  %v320_v35 = vld [vmem:[#allocation11 + $0x40] sm:$0xff]  ;;  %v337_v55 = vld [vmem:[#allocation11 + $0xc8] sm:$0xff]  ;;  %v754_v57 = vpack.c.bf16 %v333_v52, %v330_v49  ;;  %v339_v60 = vld [vmem:[#allocation11 + $0xd8] sm:$0xff] }
  0x5e   :  { %v328_v38 = vld [vmem:[#allocation11 + $0x80] sm:$0xff]  ;;  %v776_v41 = vpack.c.bf16 %v323_v36, %v320_v35  ;;  %v338_v61 = vld [vmem:[#allocation11 + $0xd0] sm:$0xff]  ;;  %v341_v62 = vld [vmem:[#allocation11 + $0xe8] sm:$0xff] }
  0x5f   :  { %v324_v40 = vld [vmem:[#allocation11 + $0x60] sm:$0xff]  ;;  %v748_v42 = vpack.c.bf16 %v328_v38, %v325_v37  ;;  %v343_v63 = vld [vmem:[#allocation11 + $0xf8] sm:$0xff]  ;;  %v346_v2 = vld [vmem:[#allocation11 + $0x110] sm:$0xff]  ;;  %v785_v5 = vpack.c.bf16 %v341_v62, %v338_v61 }
  0x60   :  { %711 = vmatpush1.bf16.msra.mxu0 %v710_v11  ;;  %736 = vmatpush3.bf16.msra.mxu1 %v735_v12  ;;  %v100_v29 = vld [vmem:[#allocation2] sm:$0xff]  ;;  %v750_v48 = vpack.c.bf16 %v327_v43, %v324_v40  ;;  %v332_v53 = vld [vmem:[#allocation11 + $0xa0] sm:$0xff]  ;;  %v342_v4 = vld [vmem:[#allocation11 + $0xf0] sm:$0xff]  ;;  %v760_v6 = vpack.c.bf16 %v346_v2, %v343_v63 }
  0x61   :  { %713 = vmatprep.subr.bf16.mxu0 %v712_v14  ;;  %737 = vmatprep.subr.bf16.mxu1 %v932_v0  ;;  %v340_v56 = vld [vmem:[#allocation11 + $0xe0] sm:$0xff]  ;;  %v782_v59 = vpack.c.bf16 %v335_v54, %v332_v53  ;;  %v345_v7 = vld [vmem:[#allocation11 + $0x108] sm:$0xff]  ;;  %v347_v9 = vld [vmem:[#allocation11 + $0x118] sm:$0xff] }
  0x62   :  { %v336_v58 = vld [vmem:[#allocation11 + $0xc0] sm:$0xff]  ;;  %v349_v10 = vld [vmem:[#allocation11 + $0x128] sm:$0xff]  ;;  %v762_v12 = vpack.c.bf16 %v345_v7, %v342_v4  ;;  %v351_v16 = vld [vmem:[#allocation11 + $0x138] sm:$0xff] }
  0x63   :  { %v758_v3 = vpack.c.bf16 %v339_v60, %v336_v58  ;;  %v344_v8 = vld [vmem:[#allocation11 + $0x100] sm:$0xff]  ;;  %v350_v17 = vld [vmem:[#allocation11 + $0x130] sm:$0xff]  ;;  %v353_v18 = vld [vmem:[#allocation11 + $0x148] sm:$0xff] }
  0x64   :  { %715 = vmatpush1.bf16.msra.mxu0 %v714_v20  ;;  %739 = vmatpush3.bf16.msra.mxu1 %v738_v21  ;;  %v352_v11 = vld [vmem:[#allocation11 + $0x140] sm:$0xff]  ;;  %v788_v14 = vpack.c.bf16 %v347_v9, %v344_v8  ;;  %v355_v19 = vld [vmem:[#allocation11 + $0x158] sm:$0xff]  ;;  %v358_v20 = vld [vmem:[#allocation11 + $0x170] sm:$0xff] }
  0x65   :  { %741 = vmatprep.subr.bf16.mxu0 %v740_v23  ;;  %772 = vmatprep.subr.bf16.mxu1 %v932_v0  ;;  %v348_v13 = vld [vmem:[#allocation11 + $0x120] sm:$0xff]  ;;  %v764_v15 = vpack.c.bf16 %v352_v11, %v349_v10  ;;  %v354_v22 = vld [vmem:[#allocation11 + $0x150] sm:$0xff]  ;;  %v791_v23 = vpack.c.bf16 %v353_v18, %v350_v17  ;;  %v768_v24 = vpack.c.bf16 %v358_v20, %v355_v19  ;;  %v357_v25 = vld [vmem:[#allocation11 + $0x168] sm:$0xff] }
  0x66   :  { %v766_v21 = vpack.c.bf16 %v351_v16, %v348_v13  ;;  %v356_v26 = vld [vmem:[#allocation11 + $0x160] sm:$0xff]  ;;  %v359_v27 = vld [vmem:[#allocation11 + $0x178] sm:$0xff]  ;;  %v770_v28 = vpack.c.bf16 %v357_v25, %v354_v22 }
  0x67   :  { %231 = vmatmul.mubr.f32.vlgmr.msra.gmra.mrb[0].mxu0 %v100_v29  ;;  %647 = vmatmul.mubr.f32.vlgmr.msra.gmra.mrb[0].mxu1 %v100_v29  ;;  %v794_v29 = vpack.c.bf16 %v359_v27, %v356_v26  ;;  %v149_v35 = vld [vmem:[%s1098_s5] ss:$2 sm:$0x7]  ;;  %v577_v46 = vld [vmem:[%s1098_s5 + $0x1] ss:$2 sm:$0x7] }
  0x68   :  { %743 = vmatpush1.bf16.msra.mxu0 %v742_v30  ;;  %774 = vmatpush3.bf16.msra.mxu1 %v773_v32  ;;  %v310_v30 = vld [vmem:[%s1095_s2] sm:$0x1]  ;;  %v152_v32 = vshrl.u32 %v151_v31, 7  ;;  %s935_s5 = smov [#allocation12]  }
  0x69   :  { %745 = vmatprep.subr.bf16.mxu0 %v744_v33  ;;  %442 = vmatprep.mubr.f32.mxu0 %v933_v1  ;;  %s552_s14 = sshll.u32 %s935_s5, 4  ;;  %s553_s14 = int_to_ptr.vmem [resolvable:$true] %s552_s14 }
  0x6a   :  { %775 = vmatprep.subr.bf16.mxu1 %v932_v0  ;;  %681 = vmatprep.mubr.msk.f32.mxu1 %vm934_vm0, %v933_v1  ;;  %v756_v1 = vpack.c.bf16 %v340_v56, %v337_v55  ;;  %v153_v33 = vsub.s32 0, %v152_v32  ;;  %v161_v34 = vsub.s32 2, %v152_v32  ;;  %v157_v36 = vsub.s32 1, %v152_v32  ;;  %s894_s15 = scalar_lea.vmem %s553_s14, 128  ;;  %p899_p0 = scmp.lt.s32.totalorder %s553_s14, %s553_s14 }
  0x6b   :  { %p895_p13 = scmp.ne.s32.totalorder %s553_s14, %s894_s15  ;;  %p900_p1 = scmp.lt.s32.totalorder %s894_s15, %s894_s15 }
  0x6c   :  { %747 = vmatpush1.bf16.msra.mxu0 %v746_v39  ;;  %777 = vmatpush3.bf16.msra.mxu1 %v776_v41  ;;  %v154_v37 = vrot.slane %v149_v35, %v153_v33  ;;  %v162_v38 = vrot.slane %v149_v35, %v161_v34  ;;  %v366_v47 = vrot.slane %v577_v46, %v153_v33 }
  0x6d   :  { %749 = vmatprep.subr.bf16.mxu0 %v748_v42  ;;  %778 = vmatprep.subr.bf16.mxu1 %v932_v0  ;;  %v374_v62 = vrot.slane %v577_v46, %v161_v34  ;;  %p901_p2 = por %p900_p1, %p899_p0 }
  0x6f   :  { %p902_p3 = pnand %p901_p2, %p895_p13 }
  0x70   :  { %751 = vmatpush1.bf16.msra.mxu0 %v750_v48  ;;  %780 = vmatpush3.bf16.msra.mxu1 %v779_v50  ;;  %v370_v48 = vrot.slane %v577_v46, %v157_v36 }
  0x71   :  { %753 = vmatprep.subr.bf16.mxu0 %v752_v51  ;;  %781 = vmatprep.subr.bf16.mxu1 %v932_v0 }
  0x74   :  { %755 = vmatpush1.bf16.msra.mxu0 %v754_v57  ;;  %783 = vmatpush3.bf16.msra.mxu1 %v782_v59 }
  0x75   :  { %757 = vmatprep.subr.bf16.mxu0 %v756_v1  ;;  %784 = vmatprep.subr.bf16.mxu1 %v932_v0 }
  0x78   :  { %759 = vmatpush1.bf16.msra.mxu0 %v758_v3  ;;  %786 = vmatpush3.bf16.msra.mxu1 %v785_v5 }
  0x79   :  { %761 = vmatprep.subr.bf16.mxu0 %v760_v6  ;;  %787 = vmatprep.subr.bf16.mxu1 %v932_v0 }
  0x7c   :  { %763 = vmatpush1.bf16.msra.mxu0 %v762_v12  ;;  %789 = vmatpush3.bf16.msra.mxu1 %v788_v14 }
  0x7d   :  { %765 = vmatprep.subr.bf16.mxu0 %v764_v15  ;;  %790 = vmatprep.subr.bf16.mxu1 %v932_v0 }
  0x80   :  { %767 = vmatpush1.bf16.msra.mxu0 %v766_v21  ;;  %792 = vmatpush3.bf16.msra.mxu1 %v791_v23 }
  0x81   :  { %769 = vmatprep.subr.bf16.mxu0 %v768_v24  ;;  %793 = vmatprep.subr.bf16.mxu1 %v932_v0  ;;  %v158_v0 = vrot.slane %v149_v35, %v157_v36 }
  0x84   :  { %771 = vmatpush1.bf16.msra.mxu0 %v770_v28  ;;  %795 = vmatpush3.bf16.msra.mxu1 %v794_v29 }
  0x87   :  { %443 = vmatmul.mubr.f32.vlgmr.msra.gmra.mrb[2].mxu0 %v310_v30  ;;  %682 = vmatmul.mubr.f32.vlgmr.msra.gmra.mrb[2].mxu1 %v310_v30 }
 0x13a   :  { %v232_v39 = vpop.f32.mrb[0].mxu0  ;;  %v303_v40 = vpop.f32.mrb[0].mxu1 }
 0x13b   :  { %v233_v41 = vadd.f32 %v232_v39, %v154_v37  ;;  %v234_v42 = vpop.f32.mrb[1].mxu0  ;;  %v304_v43 = vadd.f32 %v303_v40, %v162_v38  ;;  %v648_v44 = vpop.f32.mrb[1].mxu1 }
 0x13c   :  { %v235_v45 = vadd.f32 %v234_v42, %v158_v0 }
 0x13d   :  { %307 = vst [vmem:[#allocation3] sm:$0xff] %v233_v41  ;;  %309 = vst [vmem:[#allocation3 + $0x10] sm:$0xff] %v304_v43 }
 0x13e   :  { %308 = vst [vmem:[#allocation3 + $0x8] sm:$0xff] %v235_v45 }
 0x145   :  { %v311_v51 = vld [vmem:[#allocation3] ss:$8 sm:$0x7] }
 0x146   :  { %v527_v57 = vrot.slane %v311_v51, 1  ;;  %v537_v6 = vrot.slane %v311_v51, 2 }
 0x15a   :  { %v444_v49 = vpop.f32.mrb[2].mxu0  ;;  %v515_v50 = vpop.f32.mrb[2].mxu1 }
 0x15b   :  { %v445_v52 = vadd.f32 %v444_v49, %v366_v47  ;;  %v446_v53 = vpop.f32.mrb[3].mxu0  ;;  %v683_v54 = vpop.f32.mrb[3].mxu1  ;;  %v516_v3 = vadd.f32 %v515_v50, %v374_v62 }
 0x15c   :  { %v447_v55 = vadd.f32 %v446_v53, %v370_v48 }
 0x15d   :  { %v519_v56 = vadd.f32 %v445_v52, %v311_v51 }
 0x15e   :  { %v529_v59 = vadd.f32 %v527_v57, %v447_v55 }
 0x15f   :  { %v578_v58 = vmul.f32 -1.442695, %v519_v56 }
 0x160   :  { %v579_v1 = vmul.f32 -1.442695, %v529_v59 }
 0x161   :  { %808 = vpow2.f32 %v578_v58 }
 0x162   :  { %810 = vpow2.f32 %v579_v1 }
 0x16b   :  { %v809_v60 = vpop.eup %808 }
 0x16c   :  { %v523_v61 = vadd.f32 1.0, %v809_v60  ;;  %v811_v63 = vpop.eup %810 }
 0x16d   :  { %v533_v2 = vadd.f32 1.0, %v811_v63 }
 0x16e   :  { %812 = vrcp.f32 %v523_v61 }
 0x16f   :  { %814 = vrcp.f32 %v533_v2 }
 0x178   :  { %v813_v4 = vpop.eup %812 }
 0x179   :  { %v536_v5 = vmul.f32 %v813_v4, %v516_v3  ;;  %v815_v8 = vpop.eup %814 }
 0x17a   :  { %v541_v9 = vsub.f32 1.0, %v815_v8  ;;  %v543_v12 = vmul.f32 %v815_v8, %v310_v30 }
 0x17b   :  { %v539_v7 = vadd.f32 %v537_v6, %v536_v5 }
 0x17d   :  { %816 = vtanh.f32 %v539_v7 }
 0x187   :  { %v817_v10 = vpop.eup %816 }
 0x188   :  { %v542_v11 = vmul.f32 %v817_v10, %v541_v9 }
 0x18a   :  { %v544_v13 = vadd.f32 %v543_v12, %v542_v11 }
 0x18c   :  { %545 = vst [vmem:[#allocation12] sm:$0x1] %v544_v13 }
 0x18d   :  { %905 = shalt.err (!%p902_p3)
}
 0x18e   :  { %s906_s19 = scalar_lea.hbm %s1099_s6, 128 }
 0x18f   :  { %p907_p4 = scmp.ne.s32.totalorder %s1099_s6, %s906_s19  ;;  %p910_p5 = scmp.lt.u32.totalorder %s906_s19, %s1099_s6 }
 0x191   :  { %p912_p6 = pnand %p910_p5, %p907_p4 }
 0x193   :  { %915 = shalt.err (!%p912_p6)
}
 0x194   :  { %555 = dma.vmem_to_hbm [thread:$0]  %s553_s14, 128, %s1099_s6, [#allocation8]  }
 0x195   :  { %922 = dma.done.wait [#allocation8], 128  }
 0x196   :  { %923 = vsyncadd [#allocation8], 4294967168 }
 0x197   :  { %559 = vsyncpa [#allocation7], 1 }
 0x198   :  { %560 = vsyncpa [#allocation10], 1 }
 0x199   :  { %561 = vsyncpa [#allocation8], 1 }

</bundles_post_ra>
